<compile_context>
chip_gen: v5e
topology: v5e:2x2
jax: 0.10.0
libtpu: 0.0.40
codegen_flags: <defaults>
</compile_context>

<pallas_src>
import jax
import jax.numpy as jnp
from jax.experimental import pallas as pl
from jax.experimental.pallas import tpu as pltpu


def _identity_kernel(x_ref, o_ref):
    # Elementwise pass-through on the current VMEM tile (VPU copy).
    o_ref[...] = x_ref[...]


def _vmem_capacity_bytes() -> int:
    """Best-effort query of per-core VMEM; conservative fallback if unknown."""
    try:
        info = pltpu.get_tpu_info()
        for attr in ("vmem_capacity_bytes", "vmem_bytes", "vmem_size_bytes"):
            val = getattr(info, attr, None)
            if val:
                return int(val)
    except Exception:
        pass
    return 64 << 20  # assume the smallest (v7x-sized) VMEM


def kt_module_forward(x: jax.Array, *, max_block_bytes: int | None = None,
                      alias_input: bool = False) -> jax.Array:
    """Identity forward of the abstract ktModule as a Pallas TPU streaming copy.

    Accepts any shape/dtype.  The tensor is viewed as a lane-dense 2-D slab
    (rows, lane) with `lane` a multiple of 128 and copied through VMEM in
    large double-buffered blocks.  With alias_input=True (and the caller
    donating the input buffer, e.g. jax.jit(..., donate_argnums=0)) the copy
    is in-place and HBM traffic is halved.
    """
    orig_shape = x.shape
    dtype = x.dtype
    n = x.size
    if n == 0:
        return x

    itemsize = jnp.dtype(dtype).itemsize
    # dtype-aware sublane packing: 8 rows (f32), 16 (bf16/f16), 32 (int8/fp8).
    sub = max(8, 32 // max(1, itemsize))

    # 128-lane-aligned prefix is handled by the kernel; the (<128-element)
    # tail, if any, is patched afterwards — no full-array pad / [:n] slice.
    n_aligned = (n // 128) * 128
    if n_aligned == 0:
        # TODO(synk): less than one vreg lane of data — identity is a no-op.
        return x

    flat = x.reshape(-1)
    prefix = flat if n_aligned == n else flat[:n_aligned]

    # Widest lane-dense last dim that divides the prefix exactly -> full-width
    # unmasked vst stores, zero padding.
    lane = 128
    for cand in (4096, 2048, 1024, 512, 256):
        if n_aligned % cand == 0:
            lane = cand
            break
    rows = n_aligned // lane
    slab = prefix.reshape(rows, lane)          # contiguous -> free reshape

    # Generation-aware VMEM budget and block size.
    vmem_cap = _vmem_capacity_bytes()
    vmem_limit = (48 << 20) if vmem_cap >= (96 << 20) else (40 << 20)
    if max_block_bytes is None:
        max_block_bytes = 8 << 20
    # 2 input buffers + 2 output buffers must fit with headroom.
    max_block_bytes = min(max_block_bytes, (vmem_limit - (8 << 20)) // 4)

    # Block row count: as big as the budget allows, aligned to the dtype
    # packing, but shrunk so the grid has >= 8 steps when rows permit — with
    # dimension_semantics=("parallel",) each v7x TensorCore then runs a real
    # multi-step pipeline (input/output DMAs overlap) instead of a single step.
    cap_rows = max(sub, (max_block_bytes // (lane * itemsize)) // sub * sub)
    if rows <= sub:
        block_rows = rows                      # full-extent block (waives 8-row rule)
    else:
        min_steps = 8
        target = pl.cdiv(pl.cdiv(rows, min_steps), sub) * sub
        block_rows = max(sub, min(cap_rows, target))
    grid = (pl.cdiv(rows, block_rows),)        # partial last block is masked by Pallas

    out_slab = pl.pallas_call(
        _identity_kernel,
        out_shape=jax.ShapeDtypeStruct((rows, lane), dtype),
        grid_spec=pltpu.PrefetchScalarGridSpec(
            num_scalar_prefetch=0,
            grid=grid,
            in_specs=[pl.BlockSpec((block_rows, lane), lambda i: (i, 0))],
            out_specs=pl.BlockSpec((block_rows, lane), lambda i: (i, 0)),
        ),
        compiler_params=pltpu.CompilerParams(
            dimension_semantics=("parallel",),
            vmem_limit_bytes=vmem_limit,
        ),
        # Pure memory op: tell XLA so it can overlap surrounding HLO with it.
        cost_estimate=pl.CostEstimate(
            flops=0, transcendentals=0, bytes_accessed=2 * n_aligned * itemsize),
        # With caller-side donation this makes the copy in-place (half the HBM
        # traffic); without donation XLA falls back to a defensive copy.
        input_output_aliases=({0: 0} if alias_input else {}),
    )(slab)

    out_prefix = out_slab.reshape(-1)
    if n_aligned == n:
        return out_prefix.reshape(orig_shape)
    # Ragged tail (<128 elements): `flat` already carries the tail, so a single
    # dynamic_update_slice of the kernel's prefix output rebuilds the result in
    # one pass (vs. pad + [:n] slice = two extra full-array passes).
    return jax.lax.dynamic_update_slice(flat, out_prefix, (0,)).reshape(orig_shape)


if __name__ == "__main__":
    key = jax.random.PRNGKey(0)
    k1, k2 = jax.random.split(key)

    # Small NCHW-style input consistent with a typical module input.
    shape = (2, 4, 16, 16)
    x = jax.random.normal(k1, shape, dtype=jnp.float32)

    # Default path: out-of-place streaming copy; input stays valid afterwards.
    y = jax.block_until_ready(kt_module_forward(x))
    assert y.shape == x.shape and y.dtype == x.dtype
    assert bool(jnp.allclose(y, x)), "identity forward mismatch"

    # Aliased path: with buffer donation the copy is in-place (half the HBM
    # traffic).  The donated input must not be read afterwards, so compare
    # against values regenerated from the same PRNG key.
    x2 = jax.random.normal(k2, shape, dtype=jnp.float32)
    fwd_aliased = jax.jit(lambda a: kt_module_forward(a, alias_input=True),
                          donate_argnums=0)
    y2 = jax.block_until_ready(fwd_aliased(x2))
    expected2 = jax.random.normal(k2, shape, dtype=jnp.float32)
    assert y2.shape == shape and y2.dtype == jnp.float32
    assert bool(jnp.allclose(y2, expected2)), "aliased identity forward mismatch"

    print("KERNEL_OK")
</pallas_src>

<mosaic_0001>
module attributes {stable_mosaic.version = 11 : i64} {
  func.func @_identity_kernel(%arg0: i32, %arg1: memref<1x2048xf32, #tpu.memory_space<vmem>>, %arg2: memref<1x2048xf32, #tpu.memory_space<vmem>>) attributes {dimension_semantics = [#tpu.dimension_semantics<parallel>], iteration_bounds = array<i64: 1>, scalar_prefetch = 0 : i64, scratch_operands = 0 : i64, tpu.core_type = #tpu.core_type<tc>, window_params = [{transform_indices = @transform_0, window_bounds = array<i64: 1, 2048>}, {transform_indices = @transform_1, window_bounds = array<i64: 1, 2048>}]} {
    %c0 = arith.constant 0 : index
    %c0_0 = arith.constant 0 : index
    %0 = vector.load %arg1[%c0, %c0_0] : memref<1x2048xf32, #tpu.memory_space<vmem>>, vector<1x2048xf32>
    %c0_1 = arith.constant 0 : index
    %c0_2 = arith.constant 0 : index
    %1 = vector.load %arg2[%c0_1, %c0_2] : memref<1x2048xf32, #tpu.memory_space<vmem>>, vector<1x2048xf32>
    tpu.vector_store %arg2[%c0_1, %c0_2], %0 {strides = array<i32>} : memref<1x2048xf32, #tpu.memory_space<vmem>>, vector<1x2048xf32>,
    return
  }
  func.func @transform_0(%arg0: i32) -> (i32, i32) {
    %c0_i32 = arith.constant 0 : i32
    %c0_i32_0 = arith.constant 0 : i32
    return %arg0, %c0_i32 : i32, i32
  }
  func.func @transform_1(%arg0: i32) -> (i32, i32) {
    %c0_i32 = arith.constant 0 : i32
    %c0_i32_0 = arith.constant 0 : i32
    return %arg0, %c0_i32 : i32, i32
  }
}

</mosaic_0001>

<bundles_post_ra>
// kernel: tpu_custom_call.1
= control target key start
LH: loop header
LB: loop body
LE: loop exit
PB: predicated region body
PF: predicated region fallthrough
CT: control target
= control target key end

     0   :  { %6 = vsyncpa [#allocation3], 0  ;;  %s116_s0 = inlined_call_operand.hbm [shape: f32[1,2048], index: 0, kind: input, shape index: {}]   ;;  %s117_s1 = inlined_call_operand.hbm [shape: f32[1,2048], index: 1, kind: output, shape index: {}]  }
   0x1   :  { %7 = vsyncpa [#allocation4], 0  ;;  %s13_s8 = sshll.u32 %s116_s0, 4  ;;  %s98_s9 = smov [#allocation2]   ;;  %s14_s8 = int_to_ptr.hbm [resolvable:$true] %s13_s8 }
   0x2   :  { %s15_s10 = sshll.u32 %s98_s9, 4  ;;  %s16_s10 = int_to_ptr.vmem [resolvable:$true] %s15_s10 }
   0x3   :  { %18 = dma.hbm_to_vmem [thread:$0]  %s14_s8, 256, %s16_s10, [#allocation3]  }
   0x4   :  { %94 = dma.done.wait [#allocation3], 256  }
   0x5   :  { %95 = vsyncadd [#allocation3], 4294967040  ;;  %s99_s11 = smov [#allocation5]   ;;  %s34_s15 = sshll.u32 %s117_s1, 4  ;;  %v23_v0 = vld [vmem:[#allocation2] sm:$0xff]  ;;  %v24_v1 = vld [vmem:[#allocation2 + $0x8] sm:$0xff]  ;;  %s35_s15 = int_to_ptr.hbm [resolvable:$true] %s34_s15 }
   0x6   :  { %s32_s12 = sshll.u32 %s99_s11, 4  ;;  %25 = vst [vmem:[#allocation5] sm:$0xff] %v23_v0  ;;  %s33_s12 = int_to_ptr.vmem [resolvable:$true] %s32_s12 }
   0x7   :  { %26 = vst [vmem:[#allocation5 + $0x8] sm:$0xff] %v24_v1 }
   0x8   :  { %37 = dma.vmem_to_hbm [thread:$0]  %s33_s12, 256, %s35_s15, [#allocation4]  }
   0x9   :  { %96 = dma.done.wait [#allocation4], 256  }
   0xa   :  { %97 = vsyncadd [#allocation4], 4294967040 }
   0xb   :  { %42 = vsyncpa [#allocation3], 1 }
   0xc   :  { %43 = vsyncpa [#allocation4], 1 }

</bundles_post_ra>
